<compile_context>
chip_gen: v7x
topology: tpu7x:2x2x1
jax: 0.10.0
libtpu: 0.0.40
codegen_flags: <defaults>
</compile_context>

<pallas_src>
import functools

import jax
import jax.numpy as jnp
from jax.experimental import pallas as pl
from jax.experimental.pallas import tpu as pltpu

# ---------------- constructor configuration ----------------
N = 8          # number of Taylor terms (exponents 0 .. N-1)
N_VAR = 4      # number of variables
HIDDEN = 16    # features=(16,)  -> hidden width = N_VAR * 16 = 64

IN_DIM = N_VAR * N          # 32
HID_DIM = N_VAR * HIDDEN    # 64
OUT_DIM = N_VAR             # 4

# TODO(synk): training-mode dropout (p > 0) and arbitrary user activation
# callables are constructor knobs of the torch module; this kernel implements
# the dropout=0 (identity) + tanh configuration.


def _round_up(x: int, m: int) -> int:
    return (x + m - 1) // m * m


def _taylor_kernel(x_ref, w1t_ref, b1_ref, w2t_ref, b2_ref, out_ref, *, n):
    """Per-batch-tile kernel (transposed / lane-dense layout).

    x_ref   : (n_var, tb)          f32   input tile, batch on lanes
    w1t_ref : (hid, n_var*n)       cd    W1^T with power-major columns
    b1_ref  : (hid, 1)             f32
    w2t_ref : (n_var, hid)         cd    W2^T
    b2_ref  : (n_var, 1)           f32
    out_ref : (n_var, tb)          f32   output tile, batch on lanes
    """
    x = x_ref[...]                                   # (4, tb) f32
    cd = w1t_ref.dtype                               # matmul operand dtype

    # P^T built power-major by iterated multiplies (exact; x^0 == 1 even for
    # x == 0 / x < 0, matching torch.pow with integer exponents).
    pows = [jnp.ones_like(x)]                        # x^0
    cur = x
    for k in range(1, n):
        pows.append(cur)                             # x^k
        if k + 1 < n:
            cur = cur * x
    pt = jnp.concatenate(pows, axis=0)               # (n*n_var, tb) power-major

    # Hidden layer: activation(dropout(linear(p)));  dropout p=0 -> identity.
    # Operands in cd (bf16 fast path / f32 exact path), f32 accumulation,
    # bias add + tanh in f32 (one transcendental per element; EUP is not the
    # binding unit here, and f32 tanh is safe on v5e too).
    h = jnp.dot(w1t_ref[...], pt.astype(cd),
                preferred_element_type=jnp.float32) + b1_ref[...]
    h = jnp.tanh(h)                                  # chosen activation

    # Final (un-activated) layer.
    y = jnp.dot(w2t_ref[...], h.astype(cd),
                preferred_element_type=jnp.float32) + b2_ref[...]
    out_ref[...] = y.astype(out_ref.dtype)


def prepare_params(w1, b1, w2, b2, *, compute_dtype=jnp.float32):
    """One-time parameter repack (hoisted out of the per-call hot path).

    w1: (IN_DIM, HID_DIM)  = torch fc[0].weight.T  (rows in var-major order)
    w2: (HID_DIM, OUT_DIM) = torch fc[1].weight.T
    Returns kernel-layout params:
      w1t (HID_DIM, IN_DIM) with POWER-MAJOR columns, w2t (OUT_DIM, HID_DIM),
      biases as f32 column vectors.  compute_dtype=float32 matches the torch
      reference bit-closely; bfloat16 is the MXU-native fast path (opt-in).
    """
    j = jnp.arange(IN_DIM)
    # power-major column j = k*N_VAR + v  <-  var-major row v*N + k
    perm = (j % N_VAR) * N + (j // N_VAR)
    w1t = jnp.asarray(w1)[perm, :].T.astype(compute_dtype)        # (HID, IN)
    w2t = jnp.asarray(w2).T.astype(compute_dtype)                 # (OUT, HID)
    b1c = jnp.asarray(b1).reshape(HID_DIM, 1).astype(jnp.float32)
    b2c = jnp.asarray(b2).reshape(OUT_DIM, 1).astype(jnp.float32)
    return (w1t, b1c, w2t, b2c)


def taylor_series_forward(x, params, *, block_b: int = 8192):
    """Pallas wrapper. Handles the module's batch / non-batch convention.

    params  : output of prepare_params().
    block_b : batch rows (lanes) per grid step, rounded to a multiple of 128.
              Large tiles amortize the ~0.35us/step grid overhead; per-tile
              VMEM footprint is ~ (64+32+...) * 4B * tb  (~3 MiB at tb=8192).
    """
    w1t, b1c, w2t, b2c = params

    is_batch = x.ndim > 1
    if not is_batch:
        x = x[None, :]                                            # (1, n_var)
    B = x.shape[0]
    assert x.shape[1] == N_VAR

    # Batch tile: multiple of 128 lanes, no larger than the (padded) batch.
    tb = _round_up(min(block_b, _round_up(B, 128)), 128)
    b_pad = _round_up(B, tb)
    grid = (b_pad // tb,)

    # Transpose to the lane-dense layout (batch on lanes); the ragged tail is
    # zero-padded inside this single relayout copy (0^0==1 in the kernel is
    # harmless — padded columns are discarded below).
    xt = x.T                                                      # (n_var, B)
    if b_pad != B:
        xt = jnp.pad(xt, ((0, 0), (0, b_pad - B)))

    stream = lambda shape: pl.BlockSpec(shape, lambda i: (0, i))      # batch-tiled
    resident = lambda shape: pl.BlockSpec(shape, lambda i: (0, 0))    # VMEM-resident

    out_t = pl.pallas_call(
        functools.partial(_taylor_kernel, n=N),
        out_shape=jax.ShapeDtypeStruct((OUT_DIM, b_pad), jnp.float32),
        grid=grid,
        in_specs=[
            stream((N_VAR, tb)),              # x^T: streamed / double-buffered
            resident((HID_DIM, IN_DIM)),      # W1^T (power-major cols)
            resident((HID_DIM, 1)),           # b1
            resident((OUT_DIM, HID_DIM)),     # W2^T
            resident((OUT_DIM, 1)),           # b2
        ],
        out_specs=stream((OUT_DIM, tb)),      # y^T: lane-dense unmasked stores
        compiler_params=pltpu.CompilerParams(
            dimension_semantics=("parallel",),     # v7x: tiles split over 2 TCs
            vmem_limit_bytes=48 * 1024 * 1024),    # > v5e 16MiB / v6e 32MiB defaults,
                                                   # < v7x 64MiB physical
    )(xt, w1t, b1c, w2t, b2c)

    y = out_t[:, :B].T                                            # (B, n_var)
    if not is_batch:
        y = y[0]
    return y


def taylor_series_reference(x, w1, b1, w2, b2):
    """Pure-JAX f32 reference mirroring the PyTorch forward (var-major W1)."""
    pows = [jnp.ones_like(x)]
    for _ in range(N - 1):
        pows.append(pows[-1] * x)
    p = jnp.stack(pows, axis=-1).reshape(x.shape[0], -1)   # (B, n_var*n) var-major
    h = jnp.tanh(p @ w1 + b1)                               # dropout(p=0) identity
    return h @ w2 + b2


if __name__ == "__main__":
    key = jax.random.PRNGKey(0)
    kx, k1, k2, k3, k4 = jax.random.split(key, 5)

    # Deterministic synthetic parameters (Linear weights stored as (in, out)).
    BATCH = 300                                       # ragged on purpose
    x = jax.random.normal(kx, (BATCH, N_VAR), dtype=jnp.float32) * 0.3
    w1 = jax.random.normal(k1, (IN_DIM, HID_DIM), dtype=jnp.float32) * 0.1
    b1 = jax.random.normal(k2, (HID_DIM,), dtype=jnp.float32) * 0.1
    w2 = jax.random.normal(k3, (HID_DIM, OUT_DIM), dtype=jnp.float32) * 0.1
    b2 = jax.random.normal(k4, (OUT_DIM,), dtype=jnp.float32) * 0.1

    y_ref = taylor_series_reference(x, w1, b1, w2, b2)

    # f32 compute path (default-equivalent: bit-close to torch f32); also
    # validates the power-major W1 permutation against the var-major reference.
    params_f32 = prepare_params(w1, b1, w2, b2, compute_dtype=jnp.float32)
    y_f32 = taylor_series_forward(x, params_f32)
    jax.block_until_ready(y_f32)
    assert y_f32.shape == (BATCH, OUT_DIM)
    assert jnp.allclose(y_f32, y_ref, rtol=1e-4, atol=1e-5), (y_f32, y_ref)

    # Multi-step pipelined grid (300 rows -> 3 lane tiles of 128) incl. ragged tail.
    y_tiled = taylor_series_forward(x, params_f32, block_b=128)
    jax.block_until_ready(y_tiled)
    assert jnp.allclose(y_tiled, y_ref, rtol=1e-4, atol=1e-5), (y_tiled, y_ref)

    # Opt-in bf16 fast path: MXU-native operands, f32 accumulation.
    params_bf16 = prepare_params(w1, b1, w2, b2, compute_dtype=jnp.bfloat16)
    y_bf16 = taylor_series_forward(x, params_bf16)
    jax.block_until_ready(y_bf16)
    assert jnp.allclose(y_bf16, y_ref, rtol=5e-2, atol=5e-2), (y_bf16, y_ref)

    # Non-batch (1-D input) convention of the module.
    y_vec = taylor_series_forward(x[0], params_f32)
    jax.block_until_ready(y_vec)
    assert y_vec.shape == (OUT_DIM,)
    assert jnp.allclose(y_vec, y_ref[0], rtol=1e-4, atol=1e-5), (y_vec, y_ref[0])

    print("KERNEL_OK")
</pallas_src>

<mosaic_0001>
module attributes {stable_mosaic.version = 11 : i64} {
  func.func @_taylor_kernel(%arg0: i32, %arg1: memref<4x384xf32, #tpu.memory_space<vmem>>, %arg2: memref<64x32xf32, #tpu.memory_space<vmem>>, %arg3: memref<64x1xf32, #tpu.memory_space<vmem>>, %arg4: memref<4x64xf32, #tpu.memory_space<vmem>>, %arg5: memref<4x1xf32, #tpu.memory_space<vmem>>, %arg6: memref<4x384xf32, #tpu.memory_space<vmem>>) attributes {dimension_semantics = [#tpu.dimension_semantics<parallel>], iteration_bounds = array<i64: 1>, scalar_prefetch = 0 : i64, scratch_operands = 0 : i64, tpu.core_type = #tpu.core_type<tc>, window_params = [{transform_indices = @transform_0, window_bounds = array<i64: 4, 384>}, {pipeline_mode = #tpu.pipeline_mode<synchronous>, transform_indices = @transform_1, window_bounds = array<i64: 64, 32>}, {pipeline_mode = #tpu.pipeline_mode<synchronous>, transform_indices = @transform_2, window_bounds = array<i64: 64, 1>}, {pipeline_mode = #tpu.pipeline_mode<synchronous>, transform_indices = @transform_3, window_bounds = array<i64: 4, 64>}, {pipeline_mode = #tpu.pipeline_mode<synchronous>, transform_indices = @transform_4, window_bounds = array<i64: 4, 1>}, {transform_indices = @transform_5, window_bounds = array<i64: 4, 384>}]} {
    %c0 = arith.constant 0 : index
    %c0_0 = arith.constant 0 : index
    %0 = vector.load %arg1[%c0, %c0_0] : memref<4x384xf32, #tpu.memory_space<vmem>>, vector<4x384xf32>
    %cst = arith.constant 1.000000e+00 : f32
    %1 = vector.broadcast %cst : f32 to vector<4x384xf32>
    %2 = arith.mulf %0, %0 : vector<4x384xf32>
    %3 = arith.mulf %2, %0 : vector<4x384xf32>
    %4 = arith.mulf %3, %0 : vector<4x384xf32>
    %5 = arith.mulf %4, %0 : vector<4x384xf32>
    %6 = arith.mulf %5, %0 : vector<4x384xf32>
    %7 = arith.mulf %6, %0 : vector<4x384xf32>
    %8 = tpu.concatenate %1, %0, %2, %3, %4, %5, %6, %7 in 0 : vector<4x384xf32>, vector<4x384xf32>, vector<4x384xf32>, vector<4x384xf32>, vector<4x384xf32>, vector<4x384xf32>, vector<4x384xf32>, vector<4x384xf32> -> vector<32x384xf32>
    %c0_1 = arith.constant 0 : index
    %c0_2 = arith.constant 0 : index
    %9 = vector.load %arg2[%c0_1, %c0_2] : memref<64x32xf32, #tpu.memory_space<vmem>>, vector<64x32xf32>
    %cst_3 = arith.constant dense<0.000000e+00> : vector<64x384xf32>
    %10 = tpu.matmul %9, %8, %cst_3 {dimension_numbers = #tpu.dot_dimension_numbers<[1], [0], [0], [1], [0, 0, 1, 1], [], []>} : vector<64x32xf32>, vector<32x384xf32>, vector<64x384xf32> -> vector<64x384xf32>
    %c0_4 = arith.constant 0 : index
    %c0_5 = arith.constant 0 : index
    %11 = vector.load %arg3[%c0_4, %c0_5] : memref<64x1xf32, #tpu.memory_space<vmem>>, vector<64x1xf32>
    %12 = vector.broadcast %11 : vector<64x1xf32> to vector<64x384xf32>
    %13 = arith.addf %10, %12 : vector<64x384xf32>
    %14 = math.tanh %13 : vector<64x384xf32>
    %c0_6 = arith.constant 0 : index
    %c0_7 = arith.constant 0 : index
    %15 = vector.load %arg4[%c0_6, %c0_7] : memref<4x64xf32, #tpu.memory_space<vmem>>, vector<4x64xf32>
    %cst_8 = arith.constant dense<0.000000e+00> : vector<4x384xf32>
    %16 = tpu.matmul %15, %14, %cst_8 {dimension_numbers = #tpu.dot_dimension_numbers<[1], [0], [0], [1], [0, 0, 1, 1], [], []>} : vector<4x64xf32>, vector<64x384xf32>, vector<4x384xf32> -> vector<4x384xf32>
    %c0_9 = arith.constant 0 : index
    %c0_10 = arith.constant 0 : index
    %17 = vector.load %arg5[%c0_9, %c0_10] : memref<4x1xf32, #tpu.memory_space<vmem>>, vector<4x1xf32>
    %18 = vector.broadcast %17 : vector<4x1xf32> to vector<4x384xf32>
    %19 = arith.addf %16, %18 : vector<4x384xf32>
    %c0_11 = arith.constant 0 : index
    %c0_12 = arith.constant 0 : index
    %20 = vector.load %arg6[%c0_11, %c0_12] : memref<4x384xf32, #tpu.memory_space<vmem>>, vector<4x384xf32>
    tpu.vector_store %arg6[%c0_11, %c0_12], %19 {strides = array<i32>} : memref<4x384xf32, #tpu.memory_space<vmem>>, vector<4x384xf32>,
    return
  }
  func.func @transform_0(%arg0: i32) -> (i32, i32) {
    %c0_i32 = arith.constant 0 : i32
    %c0_i32_0 = arith.constant 0 : i32
    return %c0_i32, %arg0 : i32, i32
  }
  func.func @transform_1(%arg0: i32) -> (i32, i32) {
    %c0_i32 = arith.constant 0 : i32
    %c0_i32_0 = arith.constant 0 : i32
    %c0_i32_1 = arith.constant 0 : i32
    return %c0_i32, %c0_i32_0 : i32, i32
  }
  func.func @transform_2(%arg0: i32) -> (i32, i32) {
    %c0_i32 = arith.constant 0 : i32
    %c0_i32_0 = arith.constant 0 : i32
    %c0_i32_1 = arith.constant 0 : i32
    return %c0_i32, %c0_i32_0 : i32, i32
  }
  func.func @transform_3(%arg0: i32) -> (i32, i32) {
    %c0_i32 = arith.constant 0 : i32
    %c0_i32_0 = arith.constant 0 : i32
    %c0_i32_1 = arith.constant 0 : i32
    return %c0_i32, %c0_i32_0 : i32, i32
  }
  func.func @transform_4(%arg0: i32) -> (i32, i32) {
    %c0_i32 = arith.constant 0 : i32
    %c0_i32_0 = arith.constant 0 : i32
    %c0_i32_1 = arith.constant 0 : i32
    return %c0_i32, %c0_i32_0 : i32, i32
  }
  func.func @transform_5(%arg0: i32) -> (i32, i32) {
    %c0_i32 = arith.constant 0 : i32
    %c0_i32_0 = arith.constant 0 : i32
    return %c0_i32, %arg0 : i32, i32
  }
}

</mosaic_0001>

<bundles_post_ra>
// kernel: tpu_custom_call.1
= control target key start
LH: loop header
LB: loop body
LE: loop exit
PB: predicated region body
PF: predicated region fallthrough
CT: control target
= control target key end

     0   :  { %vm68_vm0 = vcmask 1043456   ;;  %v783_v3 = vmov 0.0   ;;  %v784_v6 = vmov 0   ;;  %s961_s0 = inlined_call_operand.vmem [shape: f32[4,384], index: 0, kind: input, shape index: {}]   ;;  %s962_s1 = inlined_call_operand.vmem [shape: f32[64,32], index: 1, kind: input, shape index: {}]   ;;  %s963_s2 = inlined_call_operand.vmem [shape: f32[64,1], index: 2, kind: input, shape index: {}]   ;;  %s964_s3 = inlined_call_operand.vmem [shape: f32[4,64], index: 3, kind: input, shape index: {}]   ;;  %s965_s4 = inlined_call_operand.vmem [shape: f32[4,1], index: 4, kind: input, shape index: {}]   ;;  %s966_s5 = inlined_call_operand.hbm [shape: f32[4,384], index: 5, kind: output, shape index: {}]  }
   0x1   :  { %v21_v0 = vld [vmem:[%s961_s0] sm:$0xff]  ;;  %226 = vmatprep.mubr.f32.mxu0 %v783_v3  ;;  %262 = vmatprep.mubr.f32.mxu1 %v783_v3  ;;  %v22_v4 = vld [vmem:[%s961_s0 + $0x8] sm:$0xf]  ;;  %v91_v11 = vld [vmem:[%s963_s2 + $0x10] sm:$0xff] }
   0x2   :  { %v23_v1 = vmul.f32 %v21_v0, %v21_v0  ;;  %v37_v2 = vcombine.low %v21_v0, %v21_v0  ;;  %v24_v5 = vmul.f32 %v22_v4, %v22_v4  ;;  %707 = vset.pattern.permute.xlu0 %v784_v6  ;;  %708 = vset.pattern.permute.xlu1 %v784_v6  ;;  %v70_v9 = vsel %vm68_vm0, 1.0, %v21_v0  ;;  %v89_v10 = vld [vmem:[%s963_s2] sm:$0xff]  ;;  %v90_v19 = vld [vmem:[%s963_s2 + $0x8] sm:$0xff] }
   0x3   :  { %99 = vperm.xlu0 %707, %v89_v10   ;;  %109 = vperm.xlu1 %708, %v91_v11  }
   0x4   :  { %v25_v7 = vmul.f32 %v23_v1, %v21_v0  ;;  %v42_v8 = vcombine.high %v23_v1, %v23_v1  ;;  %v26_v12 = vmul.f32 %v24_v5, %v22_v4  ;;  %v69_v16 = vsel %vm68_vm0, 1.0, %v37_v2 }
   0x6   :  { %v27_v13 = vmul.f32 %v25_v7, %v21_v0  ;;  %v73_v14 = vsel %vm68_vm0, %v42_v8, %v25_v7  ;;  %v46_v15 = vcombine.low %v25_v7, %v25_v7  ;;  %v28_v18 = vmul.f32 %v26_v12, %v22_v4 }
   0x7   :  { %v654_v17 = vpack.c.bf16 %v73_v14, %v70_v9 }
   0x8   :  { %10 = vsyncpa [#allocation3], 0  ;;  %v72_v20 = vsel %vm68_vm0, %v23_v1, %v46_v15  ;;  %v29_v21 = vmul.f32 %v27_v13, %v21_v0  ;;  %v51_v22 = vcombine.high %v27_v13, %v27_v13  ;;  %v38_v23 = vcombine.low %v22_v4, %v22_v4  ;;  %v92_v27 = vld [vmem:[%s963_s2 + $0x18] sm:$0xff]  ;;  %104 = vperm.xlu0 %707, %v90_v19   ;;  %v93_v31 = vld [vmem:[%s963_s2 + $0x20] sm:$0xff]  ;;  %s787_s28 = smov [#allocation2]  }
   0x9   :  { %655 = vmatprep.subr.bf16.mxu0 %v654_v17  ;;  %698 = vmatprep.subr.bf16.mxu1 %v654_v17  ;;  %v656_v24 = vpack.c.bf16 %v72_v20, %v69_v16  ;;  %v47_v25 = vcombine.low %v26_v12, %v26_v12  ;;  %v30_v26 = vmul.f32 %v28_v18, %v22_v4  ;;  %v94_v39 = vld [vmem:[%s963_s2 + $0x28] sm:$0xff]  ;;  %v95_v45 = vld [vmem:[%s963_s2 + $0x30] sm:$0xff]  ;;  %v96_v51 = vld [vmem:[%s963_s2 + $0x38] sm:$0xff]  ;;  %vm137_vm1 = vcmask 261120   ;;  %s568_s29 = sshll.u32 %s787_s28, 4  ;;  %s569_s29 = int_to_ptr.vmem [resolvable:$true] %s568_s29 }
   0xa   :  { %v31_v28 = vmul.f32 %v29_v21, %v21_v0  ;;  %v55_v29 = vcombine.low %v29_v21, %v29_v21  ;;  %v76_v34 = vsel %vm68_vm0, %v51_v22, %v29_v21  ;;  %114 = vperm.xlu1 %708, %v92_v27   ;;  %v71_v35 = vsel %vm68_vm0, 1.0, %v38_v23  ;;  %v81_v52 = vld [vmem:[%s962_s1] sm:$0xff]  ;;  %v87_v53 = vld [vmem:[%s962_s1 + $0x30] sm:$0xff]  ;;  %v82_v56 = vld [vmem:[%s962_s1 + $0x8] sm:$0xff]  ;;  %p764_p1 = scmp.lt.s32.totalorder %s569_s29, %s569_s29 }
   0xb   :  { %657 = vmatpush1.bf16.msra.mxu0 %v656_v24  ;;  %700 = vmatpush1.bf16.msra.mxu1 %v656_v24  ;;  %v32_v30 = vmul.f32 %v30_v26, %v22_v4  ;;  %v74_v36 = vsel %vm68_vm0, %v24_v5, %v47_v25  ;;  %v56_v38 = vcombine.low %v30_v26, %v30_v26  ;;  %v405_v55 = vld [vmem:[%s965_s4] sm:$0xf]  ;;  %v88_v57 = vld [vmem:[%s962_s1 + $0x38] sm:$0xff]  ;;  %v83_v58 = vld [vmem:[%s962_s1 + $0x10] sm:$0xff]  ;;  %v785_v62 = vmov 0.0|0.0  }
   0xc   :  { %v33_v32 = vmul.f32 %v31_v28, %v21_v0  ;;  %v60_v33 = vcombine.high %v31_v28, %v31_v28  ;;  %v75_v42 = vsel %vm68_vm0, %v27_v13, %v55_v29  ;;  %119 = vperm.xlu0 %707, %v93_v31   ;;  %v662_v47 = vpack.c.bf16 %v74_v36, %v71_v35  ;;  %v84_v59 = vld [vmem:[%s962_s1 + $0x18] sm:$0xff]  ;;  %v85_v60 = vld [vmem:[%s962_s1 + $0x20] sm:$0xff]  ;;  %v86_v61 = vld [vmem:[%s962_s1 + $0x28] sm:$0xff] }
   0xd   :  { %v34_v37 = vmul.f32 %v32_v30, %v22_v4  ;;  %v77_v49 = vsel %vm68_vm0, %v28_v18, %v56_v38  ;;  %vm786_vm2 = vmmov 0   ;;  %vm411_vm3 = vcmask 523264  }
   0xe   :  { %v79_v40 = vsel %vm68_vm0, %v60_v33, %v33_v32  ;;  %v64_v41 = vcombine.low %v33_v32, %v33_v32  ;;  %124 = vperm.xlu1 %708, %v94_v39  }
   0xf   :  { %v658_v43 = vpack.c.bf16 %v79_v40, %v76_v34  ;;  %v65_v44 = vcombine.low %v34_v37, %v34_v37 }
  0x10   :  { %v78_v46 = vsel %vm68_vm0, %v31_v28, %v64_v41  ;;  %129 = vperm.xlu0 %707, %v95_v45  }
  0x11   :  { %659 = vmatprep.subr.bf16.mxu0 %v658_v43  ;;  %699 = vmatprep.subr.bf16.mxu1 %v658_v43  ;;  %v660_v48 = vpack.c.bf16 %v78_v46, %v75_v42  ;;  %v80_v50 = vsel %vm68_vm0, %v32_v30, %v65_v44 }
  0x12   :  { %v666_v54 = vpack.c.bf16 %v80_v50, %v77_v49  ;;  %134 = vperm.xlu1 %708, %v96_v51  }
  0x13   :  { %661 = vmatpush1.bf16.msra.mxu0 %v660_v48  ;;  %701 = vmatpush1.bf16.msra.mxu1 %v660_v48 }
  0x14   :  { %663 = vmatprep.subr.bf16.mxu1 %v662_v47  ;;  %408 = vperm.xlu0 %707, %v405_v55  }
  0x15   :  { %686 = vmatprep.subr.bf16.mxu0 %v785_v62 }
  0x16   :  { %576 = vmatmul.mubr.msk.f32.vlgmr.msra.gmra.mrb[0].mxu0 %vm137_vm1, %v81_v52  ;;  %582 = vmatmul.mubr.msk.f32.vlgmr.msra.gmra.mrb[0].mxu1 %vm137_vm1, %v87_v53 }
  0x17   :  { %665 = vmatpush3.bf16.msra.mxu1 %v662_v47  ;;  %232 = vmatprep.mubr.f32.mxu0 %v783_v3 }
  0x18   :  { %268 = vmatprep.mubr.f32.mxu1 %v783_v3  ;;  %667 = vmatprep.subr.bf16.mxu1 %v666_v54 }
  0x1a   :  { %577 = vmatmul.mubr.msk.f32.gmra.mrb[2].mxu0 %vm137_vm1, %v82_v56  ;;  %583 = vmatmul.mubr.msk.f32.gmra.mrb[2].mxu1 %vm137_vm1, %v88_v57 }
  0x1b   :  { %669 = vmatpush3.bf16.msra.mxu1 %v666_v54  ;;  %238 = vmatprep.mubr.f32.mxu0 %v783_v3 }
  0x1c   :  { %623 = vmatprep.mubr.msk.f32.mxu1 %vm137_vm1, %v81_v52 }
  0x1e   :  { %578 = vmatmul.mubr.msk.f32.gmra.mrb[4].mxu0 %vm137_vm1, %v83_v58  ;;  %624 = vmatmul.mubr.msk.f32.vlgmr.msra.gmra.mrb[4].mxu1 %vm137_vm1, %v82_v56 }
  0x1f   :  { %244 = vmatprep.mubr.f32.mxu0 %v783_v3  ;;  %626 = vmatprep.mubr.msk.f32.mxu1 %vm137_vm1, %v83_v58 }
  0x22   :  { %579 = vmatmul.mubr.msk.f32.gmra.mrb[6].mxu0 %vm137_vm1, %v84_v59  ;;  %627 = vmatmul.mubr.msk.f32.gmra.mrb[6].mxu1 %vm137_vm1, %v84_v59 }
  0x23   :  { %250 = vmatprep.mubr.f32.mxu0 %v783_v3  ;;  %629 = vmatprep.mubr.msk.f32.mxu1 %vm137_vm1, %v85_v60 }
  0x26   :  { %580 = vmatmul.mubr.msk.f32.gmra.mrb[8].mxu0 %vm137_vm1, %v85_v60  ;;  %630 = vmatmul.mubr.msk.f32.gmra.mrb[8].mxu1 %vm137_vm1, %v86_v61 }
  0x27   :  { %256 = vmatprep.mubr.f32.mxu0 %v783_v3  ;;  %632 = vmatprep.mubr.msk.f32.mxu1 %vm137_vm1, %v87_v53 }
  0x2a   :  { %581 = vmatmul.mubr.msk.f32.gmra.mrb[10].mxu0 %vm137_vm1, %v86_v61  ;;  %633 = vmatmul.mubr.msk.f32.gmra.mrb[10].mxu1 %vm137_vm1, %v88_v57 }
  0x2b   :  { %479 = vmatprep.mubr.f32.mxu1 %v783_v3  ;;  %651 = vmatprep.mubr.msk.f32.mxu0 %vm786_vm2, %v783_v3 }
  0x82   :  { %v100_v63 = vpop.permute.xlu0 %99  ;;  %v110_v0 = vpop.permute.xlu1 %109 }
  0x87   :  { %v105_v1 = vpop.permute.xlu0 %104 }
  0x89   :  { %v115_v2 = vpop.permute.xlu1 %114 }
  0x8b   :  { %v914_v4 = vpop.permute.xlu0 %119 }
  0x8d   :  { %v916_v5 = vpop.permute.xlu1 %124 }
  0x8f   :  { %v918_v6 = vpop.permute.xlu0 %129 }
  0x91   :  { %v922_v14 = vpop.permute.xlu1 %134 }
  0xe9   :  { %v228_v7 = vpop.f32.mrb[0].mxu0  ;;  %v264_v8 = vpop.f32.mrb[0].mxu1 }
  0xea   :  { %v229_v9 = vadd.f32 %v228_v7, %v100_v63  ;;  %v265_v10 = vadd.f32 %v264_v8, %v918_v6  ;;  %v230_v11 = vpop.f32.mrb[1].mxu0  ;;  %v266_v12 = vpop.f32.mrb[1].mxu1 }
  0xeb   :  { %v231_v13 = vadd.f32 %v230_v11, %v100_v63  ;;  %v267_v3 = vadd.f32 %v266_v12, %v918_v6 }
  0xec   :  { %711 = vtanh.f32 %v229_v9 }
  0xed   :  { %713 = vtanh.f32 %v265_v10  ;;  %v234_v15 = vpop.f32.mrb[2].mxu0  ;;  %v270_v16 = vpop.f32.mrb[2].mxu1 }
  0xee   :  { %715 = vtanh.f32 %v231_v13  ;;  %v235_v17 = vadd.f32 %v234_v15, %v105_v1  ;;  %v271_v18 = vadd.f32 %v270_v16, %v922_v14  ;;  %v236_v19 = vpop.f32.mrb[3].mxu0  ;;  %v272_v20 = vpop.f32.mrb[3].mxu1 }
  0xef   :  { %717 = vtanh.f32 %v267_v3  ;;  %v237_v21 = vadd.f32 %v236_v19, %v105_v1  ;;  %v273_v22 = vadd.f32 %v272_v20, %v922_v14 }
  0xf0   :  { %719 = vtanh.f32 %v235_v17 }
  0xf1   :  { %721 = vtanh.f32 %v271_v18  ;;  %v240_v23 = vpop.f32.mrb[4].mxu0  ;;  %v625_v24 = vpop.f32.mrb[4].mxu1 }
  0xf2   :  { %723 = vtanh.f32 %v237_v21  ;;  %v241_v25 = vadd.f32 %v240_v23, %v110_v0  ;;  %v347_v26 = vadd.f32 %v625_v24, %v105_v1  ;;  %v242_v27 = vpop.f32.mrb[5].mxu0  ;;  %v341_v28 = vpop.f32.mrb[5].mxu1 }
  0xf3   :  { %725 = vtanh.f32 %v273_v22  ;;  %v243_v29 = vadd.f32 %v242_v27, %v110_v0  ;;  %v342_v30 = vadd.f32 %v341_v28, %v100_v63  ;;  %v404_v28 = vld [vmem:[%s964_s3] sm:$0xf]  ;;  %s759_s3 = scalar_lea.vmem %s569_s29, 192 }
  0xf4   :  { %727 = vtanh.f32 %v241_v25  ;;  %p760_p0 = scmp.ne.s32.totalorder %s569_s29, %s759_s3  ;;  %p765_p2 = scmp.lt.s32.totalorder %s759_s3, %s759_s3 }
  0xf5   :  { %729 = vtanh.f32 %v347_v26  ;;  %v246_v31 = vpop.f32.mrb[6].mxu0  ;;  %v628_v32 = vpop.f32.mrb[6].mxu1 }
  0xf6   :  { %v712_v33 = vpop.eup %711  ;;  %731 = vtanh.f32 %v243_v29  ;;  %v247_v34 = vadd.f32 %v246_v31, %v115_v2  ;;  %v357_v35 = vadd.f32 %v628_v32, %v115_v2  ;;  %v248_v36 = vpop.f32.mrb[7].mxu0  ;;  %p766_p3 = por %p765_p2, %p764_p1 }
  0xf7   :  { %v351_v37 = vpop.f32.mrb[7].mxu1  ;;  %v926_v38 = vpop.eup %713  ;;  %733 = vtanh.f32 %v342_v30  ;;  %v249_v39 = vadd.f32 %v248_v36, %v115_v2 }
  0xf8   :  { %v352_v40 = vadd.f32 %v351_v37, %v110_v0  ;;  %v716_v41 = vpop.eup %715  ;;  %735 = vtanh.f32 %v247_v34  ;;  %v409_v29 = vpop.permute.xlu0 %408  ;;  %p767_p4 = pnand %p766_p3, %p760_p0 }
  0xf9   :  { %v928_v42 = vpop.eup %717  ;;  %737 = vtanh.f32 %v357_v35  ;;  %v252_v43 = vpop.f32.mrb[8].mxu0 }
  0xfa   :  { %v631_v44 = vpop.f32.mrb[8].mxu1  ;;  %v720_v45 = vpop.eup %719  ;;  %739 = vtanh.f32 %v249_v39  ;;  %v253_v46 = vadd.f32 %v252_v43, %v914_v4 }
  0xfb   :  { %v367_v47 = vadd.f32 %v631_v44, %v916_v5  ;;  %v254_v48 = vpop.f32.mrb[9].mxu0  ;;  %v361_v49 = vpop.f32.mrb[9].mxu1  ;;  %741 = vtanh.f32 %v352_v40  ;;  %v672_v53 = vpack.c.bf16 %v720_v45, %v712_v33 }
  0xfc   :  { %v932_v50 = vpop.eup %721  ;;  %v255_v51 = vadd.f32 %v254_v48, %v914_v4  ;;  %v362_v52 = vadd.f32 %v361_v49, %v914_v4  ;;  %743 = vtanh.f32 %v253_v46 }
  0xfd   :  { %v724_v54 = vpop.eup %723  ;;  %v684_v55 = vpack.c.bf16 %v932_v50, %v926_v38  ;;  %745 = vtanh.f32 %v367_v47  ;;  %v258_v57 = vpop.f32.mrb[10].mxu0 }
  0xfe   :  { %v726_v56 = vpop.eup %725  ;;  %v634_v58 = vpop.f32.mrb[10].mxu1  ;;  %v670_v59 = vpack.c.bf16 %v724_v54, %v716_v41  ;;  %747 = vtanh.f32 %v255_v51  ;;  %v259_v61 = vadd.f32 %v258_v57, %v916_v5 }
  0xff   :  { %v728_v60 = vpop.eup %727  ;;  %v377_v63 = vadd.f32 %v634_v58, %v922_v14  ;;  %v260_v0 = vpop.f32.mrb[11].mxu0  ;;  %v682_v2 = vpack.c.bf16 %v726_v56, %v928_v42  ;;  %749 = vtanh.f32 %v362_v52 }
 0x100   :  { %v371_v1 = vpop.f32.mrb[11].mxu1  ;;  %v730_v4 = vpop.eup %729  ;;  %v261_v7 = vadd.f32 %v260_v0, %v916_v5  ;;  %671 = vmatprep.subr.bf16.mxu1 %v670_v59  ;;  %751 = vtanh.f32 %v259_v61 }
 0x101   :  { %v372_v8 = vadd.f32 %v371_v1, %v918_v6  ;;  %v732_v9 = vpop.eup %731  ;;  %673 = vmatpush1.bf16.msra.mxu1 %v672_v53  ;;  %753 = vtanh.f32 %v377_v63 }
 0x102   :  { %v734_v10 = vpop.eup %733  ;;  %755 = vtanh.f32 %v261_v7 }
 0x103   :  { %v736_v11 = vpop.eup %735  ;;  %v687_v12 = vpack.c.bf16 %v730_v4, %v734_v10  ;;  %757 = vtanh.f32 %v372_v8 }
 0x104   :  { %v738_v13 = vpop.eup %737  ;;  %v676_v3 = vpack.c.bf16 %v736_v11, %v728_v60 }
 0x105   :  { %v740_v14 = vpop.eup %739  ;;  %688 = vmatpush3.bf16.msra.mxu0 %v687_v12 }
 0x106   :  { %v742_v15 = vpop.eup %741  ;;  %689 = vmatprep.subr.bf16.mxu0 %v785_v62  ;;  %v674_v5 = vpack.c.bf16 %v740_v14, %v732_v9 }
 0x107   :  { %v744_v16 = vpop.eup %743  ;;  %v690_v6 = vpack.c.bf16 %v738_v13, %v742_v15 }
 0x108   :  { %v746_v17 = vpop.eup %745  ;;  %675 = vmatprep.subr.bf16.mxu1 %v674_v5 }
 0x109   :  { %v748_v18 = vpop.eup %747  ;;  %691 = vmatpush3.bf16.msra.mxu0 %v690_v6  ;;  %677 = vmatpush1.bf16.msra.mxu1 %v676_v3 }
 0x10a   :  { %v750_v19 = vpop.eup %749  ;;  %692 = vmatprep.subr.bf16.mxu0 %v785_v62 }
 0x10b   :  { %v752_v20 = vpop.eup %751  ;;  %v693_v21 = vpack.c.bf16 %v746_v17, %v750_v19 }
 0x10c   :  { %v754_v22 = vpop.eup %753  ;;  %v680_v23 = vpack.c.bf16 %v752_v20, %v744_v16 }
 0x10d   :  { %v756_v24 = vpop.eup %755  ;;  %694 = vmatpush3.bf16.msra.mxu0 %v693_v21 }
 0x10e   :  { %v758_v25 = vpop.eup %757  ;;  %695 = vmatprep.subr.bf16.mxu0 %v785_v62  ;;  %v678_v26 = vpack.c.bf16 %v756_v24, %v748_v18 }
 0x10f   :  { %v696_v27 = vpack.c.bf16 %v754_v22, %v758_v25 }
 0x110   :  { %679 = vmatprep.subr.bf16.mxu1 %v678_v26 }
 0x111   :  { %697 = vmatpush3.bf16.msra.mxu0 %v696_v27  ;;  %681 = vmatpush1.bf16.msra.mxu1 %v680_v23 }
 0x112   :  { %683 = vmatprep.subr.bf16.mxu1 %v682_v2 }
 0x114   :  { %652 = vmatmul.mubr.msk.f32.vlgmr.msra.gmra.mrb[12].mxu0 %vm411_vm3, %v404_v28 }
 0x115   :  { %685 = vmatpush1.bf16.msra.mxu1 %v684_v55 }
 0x118   :  { %592 = vmatmul.mubr.msk.f32.vlgmr.msra.gmra.mrb[12].mxu1 %vm411_vm3, %v404_v28 }
 0x1e7   :  { %v552_v30 = vpop.f32.mrb[12].mxu0 }
 0x1e8   :  { %v553_v31 = vadd.f32 %v552_v30, %v409_v29  ;;  %v653_v32 = vpop.f32.mrb[13].mxu0 }
 0x1ea   :  { %561 = vst [vmem:[#allocation2 + $0x8] sm:$0xf] %v553_v31 }
 0x1eb   :  { %v481_v62 = vpop.f32.mrb[12].mxu1 }
 0x1ec   :  { %v482_v33 = vadd.f32 %v481_v62, %v409_v29  ;;  %v483_v34 = vpop.f32.mrb[13].mxu1 }
 0x1ed   :  { %v484_v35 = vadd.f32 %v483_v34, %v409_v29 }
 0x1ef   :  { %v558_v36 = vcombine.low %v482_v33, %v484_v35 }
 0x1f1   :  { %560 = vst [vmem:[#allocation2] sm:$0xff] %v558_v36 }
 0x1f2   :  { %770 = shalt.err (!%p767_p4)
}
 0x1f3   :  { %s771_s7 = scalar_lea.hbm %s966_s5, 192 }
 0x1f4   :  { %p772_p5 = scmp.ne.s32.totalorder %s966_s5, %s771_s7  ;;  %p775_p6 = scmp.lt.u32.totalorder %s771_s7, %s966_s5 }
 0x1f6   :  { %p777_p7 = pnand %p775_p6, %p772_p5 }
 0x1f8   :  { %780 = shalt.err (!%p777_p7)
}
 0x1f9   :  { %571 = dma.vmem_to_hbm [thread:$0]  %s569_s29, 192, %s966_s5, [#allocation3]  }
 0x1fa   :  { %781 = dma.done.wait [#allocation3], 192  }
 0x1fb   :  { %782 = vsyncadd [#allocation3], 4294967104 }
 0x1fc   :  { %575 = vsyncpa [#allocation3], 1 }

</bundles_post_ra>
